<compile_context>
chip_gen: v5e
topology: v5e:2x2
jax: 0.10.0
libtpu: 0.0.40
codegen_flags: <defaults>
</compile_context>

<pallas_src>
import functools

import jax
import jax.numpy as jnp
from jax.experimental import pallas as pl
from jax.experimental.pallas import tpu as pltpu


def _make_divisible(ch, divisor=8, min_ch=None):
    if min_ch is None:
        min_ch = divisor
    new_ch = max(min_ch, int(ch + divisor / 2) // divisor * divisor)
    if new_ch < 0.9 * ch:
        new_ch += divisor
    return new_ch


# ---------------------------------------------------------------------------
# Generation-aware sizing (v5e/v6e: 128 MiB VMEM, 1 TC; v7x: 64 MiB, 2 TC)
# ---------------------------------------------------------------------------
def _tpu_vmem_capacity_bytes():
    try:
        info = pltpu.get_tpu_info()
        cap = getattr(info, "vmem_capacity_bytes", None)
        if cap:
            return int(cap)
    except Exception:
        pass
    return 64 * 1024 * 1024  # conservative default (v7x per-TensorCore physical VMEM)


def _num_tensorcores_per_chip():
    try:
        kind = str(getattr(jax.devices()[0], "device_kind", "")).lower()
        if any(t in kind for t in ("v7", "v4", "v5p")):
            return 2  # dual-TensorCore / megacore chips
    except Exception:
        pass
    return 1


def _pick_block_batch(n, bytes_per_image, target_bytes, num_cores):
    """Largest divisor nb of n whose (nb, C, HWp) block fits target_bytes.

    Dual-TC chips prefer a grid length divisible by the core count (balanced
    megacore split); single-TC chips happily use a grid of 1 (one big block).
    Returns 0 if even a single image plane does not fit -> HW-split fallback.
    """
    if bytes_per_image > target_bytes:
        return 0
    fitting = [d for d in range(1, n + 1)
               if n % d == 0 and d * bytes_per_image <= target_bytes]
    if num_cores > 1:
        balanced = [d for d in fitting if (n // d) % num_cores == 0]
        if balanced:
            return max(balanced)
    return max(fitting)


def _pick_hw_chunk(hw_padded, bytes_per_hw_col, target_bytes):
    """Largest multiple-of-128 divisor of hw_padded whose block fits target_bytes."""
    groups = hw_padded // 128
    best = 128
    for m in range(1, groups + 1):
        if groups % m:
            continue
        if m * 128 * bytes_per_hw_col <= target_bytes:
            best = m * 128
    return best


# ---------------------------------------------------------------------------
# Kernels
# ---------------------------------------------------------------------------
def _se_fused_kernel(x_ref, w1_ref, b1_ref, w2_ref, b2_ref, o_ref, *, inv_hw):
    # x_ref: (Nb, C, HWp) block -- HW on lanes, C on sublanes.
    # Spatial mean (f32 accumulation).  Padded lanes are zero, so they do not
    # perturb the sum; divide by the *true* HW.
    mean = jnp.sum(x_ref[...], axis=-1, dtype=jnp.float32) * inv_hw           # (Nb, C)

    # fc1/fc2 are tiny dots; the kernel is HBM-bandwidth bound on x, so no
    # MXU-shape gymnastics are worthwhile here.
    s1 = jnp.dot(mean, w1_ref[...], preferred_element_type=jnp.float32) + b1_ref[...]
    s1 = jnp.maximum(s1, 0.0)                                                 # (Nb, Cs)
    s2 = jnp.dot(s1, w2_ref[...], preferred_element_type=jnp.float32) + b2_ref[...]
    scale = jnp.clip(s2 + 3.0, 0.0, 6.0) * (1.0 / 6.0)                        # hardsigmoid

    # Re-read x_ref for the multiply instead of holding the whole block live
    # across the reduction + dots (low vreg pressure as blocks grow to 8-16 MiB).
    o_ref[...] = (x_ref[...] * scale[:, :, None].astype(o_ref.dtype)).astype(o_ref.dtype)


def _se_scale_kernel(x_ref, w1_ref, b1_ref, w2_ref, b2_ref, s_ref, acc_ref, *, inv_hw):
    # Fallback pass 1: accumulate per-channel spatial sums across HW chunks,
    # then run fc1 -> ReLU -> fc2 -> hardsigmoid once at the last chunk.
    h = pl.program_id(1)

    @pl.when(h == 0)
    def _():
        acc_ref[...] = jnp.zeros_like(acc_ref)

    acc_ref[...] += jnp.sum(x_ref[...], axis=-1, keepdims=True, dtype=jnp.float32)

    @pl.when(h == pl.num_programs(1) - 1)
    def _():
        mean = acc_ref[...][:, :, 0] * inv_hw                                 # (1, C)
        s1 = jnp.dot(mean, w1_ref[...], preferred_element_type=jnp.float32) + b1_ref[...]
        s1 = jnp.maximum(s1, 0.0)
        s2 = jnp.dot(s1, w2_ref[...], preferred_element_type=jnp.float32) + b2_ref[...]
        scale = jnp.clip(s2 + 3.0, 0.0, 6.0) * (1.0 / 6.0)                    # (1, C)
        s_ref[...] = scale[:, :, None]                                        # (1, C, 1)


def _se_apply_kernel(x_ref, s_ref, o_ref):
    # Fallback pass 2: broadcast-multiply a (1, C, hw_chunk) block by the scale.
    o_ref[...] = (x_ref[...] * s_ref[...].astype(o_ref.dtype)).astype(o_ref.dtype)


# ---------------------------------------------------------------------------
# Wrapper
# ---------------------------------------------------------------------------
def squeeze_excitation_pallas(x_nchw, w1, b1, w2, b2, *, block_bytes=None):
    """x_nchw: (N, C, H, W). w1: (C, Cs), b1: (1, Cs), w2: (Cs, C), b2: (1, C)."""
    N, C, H, W = x_nchw.shape
    HW = H * W
    Cs = w1.shape[1]
    itemsize = x_nchw.dtype.itemsize

    # ---- generation-aware VMEM budget & block sizing -----------------------
    vmem_cap = _tpu_vmem_capacity_bytes()
    # 128-MiB chips (v5e/v6e) -> 96 MiB scoped limit; v7x (64 MiB) -> 48 MiB.
    vmem_limit = max(min(3 * vmem_cap // 4, 96 * 1024 * 1024), 32 * 1024 * 1024)
    # in + out double-buffered => ~4x block resident; /6 leaves param/scratch headroom.
    target = block_bytes if block_bytes is not None else max(vmem_limit // 6, 1 << 20)
    num_cores = _num_tensorcores_per_chip()

    # ---- lane-dense spatial axis -------------------------------------------
    # Free reshape of NCHW; HW goes on lanes.  Real SE spatial sizes (49/196/784)
    # are not multiples of 128, so pad HW to lane-dense 128k: unmasked vst /
    # full-width DMA rows in the kernel, at the cost of one wrapper pad + slice.
    # TODO(synk): with a lane-dense producer layout upstream this pad/slice disappears.
    x = x_nchw.reshape(N, C, HW)
    HWp = ((HW + 127) // 128) * 128
    if HWp != HW:
        x = jnp.pad(x, ((0, 0), (0, 0), (0, HWp - HW)))

    inv_hw = 1.0 / float(HW)
    bytes_per_image = C * HWp * itemsize
    nb = _pick_block_batch(N, bytes_per_image, target, num_cores)

    if nb > 0:
        # ---- fused single-pass path: one read + one write of x -------------
        grid = N // nb
        cost = pl.CostEstimate(
            flops=2 * N * C * HW + 4 * N * C * Cs,
            transcendentals=0,
            bytes_accessed=2 * N * C * HWp * itemsize
            + (w1.size + b1.size + w2.size + b2.size) * w1.dtype.itemsize,
        )
        out = pl.pallas_call(
            functools.partial(_se_fused_kernel, inv_hw=inv_hw),
            out_shape=jax.ShapeDtypeStruct((N, C, HWp), x.dtype),
            grid_spec=pltpu.PrefetchScalarGridSpec(
                num_scalar_prefetch=0,
                grid=(grid,),
                in_specs=[
                    pl.BlockSpec((nb, C, HWp), lambda n: (n, 0, 0)),
                    # params: constant index_map => fetched once, stay resident.
                    pl.BlockSpec((C, Cs), lambda n: (0, 0)),
                    pl.BlockSpec((1, Cs), lambda n: (0, 0)),
                    pl.BlockSpec((Cs, C), lambda n: (0, 0)),
                    pl.BlockSpec((1, C), lambda n: (0, 0)),
                ],
                out_specs=pl.BlockSpec((nb, C, HWp), lambda n: (n, 0, 0)),
            ),
            compiler_params=pltpu.CompilerParams(
                dimension_semantics=("parallel",),
                vmem_limit_bytes=vmem_limit,
            ),
            cost_estimate=cost,
            # Scaled result written back into x's HBM buffer: blocks are
            # disjoint and each step writes exactly the block it read.
            input_output_aliases={0: 0},
        )(x, w1, b1, w2, b2)
    else:
        # ---- HW-split fallback: one (C, HWp) plane exceeds the budget ------
        hw_chunk = _pick_hw_chunk(HWp, C * itemsize, target)
        n_chunks = HWp // hw_chunk

        scale = pl.pallas_call(
            functools.partial(_se_scale_kernel, inv_hw=inv_hw),
            out_shape=jax.ShapeDtypeStruct((N, C, 1), jnp.float32),
            grid_spec=pltpu.PrefetchScalarGridSpec(
                num_scalar_prefetch=0,
                grid=(N, n_chunks),
                in_specs=[
                    pl.BlockSpec((1, C, hw_chunk), lambda n, h: (n, 0, h)),
                    pl.BlockSpec((C, Cs), lambda n, h: (0, 0)),
                    pl.BlockSpec((1, Cs), lambda n, h: (0, 0)),
                    pl.BlockSpec((Cs, C), lambda n, h: (0, 0)),
                    pl.BlockSpec((1, C), lambda n, h: (0, 0)),
                ],
                out_specs=pl.BlockSpec((1, C, 1), lambda n, h: (n, 0, 0)),
                scratch_shapes=[pltpu.VMEM((1, C, 1), jnp.float32)],
            ),
            compiler_params=pltpu.CompilerParams(
                dimension_semantics=("parallel", "arbitrary"),
                vmem_limit_bytes=vmem_limit,
            ),
        )(x, w1, b1, w2, b2)

        out = pl.pallas_call(
            _se_apply_kernel,
            out_shape=jax.ShapeDtypeStruct((N, C, HWp), x.dtype),
            grid_spec=pltpu.PrefetchScalarGridSpec(
                num_scalar_prefetch=0,
                grid=(N, n_chunks),
                in_specs=[
                    pl.BlockSpec((1, C, hw_chunk), lambda n, h: (n, 0, h)),
                    pl.BlockSpec((1, C, 1), lambda n, h: (n, 0, 0)),
                ],
                out_specs=pl.BlockSpec((1, C, hw_chunk), lambda n, h: (n, 0, h)),
            ),
            compiler_params=pltpu.CompilerParams(
                dimension_semantics=("parallel", "parallel"),
                vmem_limit_bytes=vmem_limit,
            ),
            input_output_aliases={0: 0},
        )(x, scale)

    if HWp != HW:
        out = out[:, :, :HW]
    return out.reshape(N, C, H, W)


def _reference(x_nchw, w1, b1, w2, b2):
    # pure-JAX reference of the PyTorch forward
    mean = jnp.mean(x_nchw, axis=(2, 3))                        # (N, C)
    s1 = jnp.maximum(mean @ w1 + b1, 0.0)                       # (N, Cs)
    s2 = s1 @ w2 + b2                                           # (N, C)
    scale = jnp.clip(s2 + 3.0, 0.0, 6.0) / 6.0                  # hardsigmoid
    return x_nchw * scale[:, :, None, None]


if __name__ == "__main__":
    key = jax.random.PRNGKey(0)
    k1, k2, k3 = jax.random.split(key, 3)

    def run_case(k, N, C, H, W, squeeze_factor=4, block_bytes=None):
        Cs = _make_divisible(C // squeeze_factor, 8)
        kx, kw1, kb1, kw2, kb2 = jax.random.split(k, 5)
        x = jax.random.normal(kx, (N, C, H, W), dtype=jnp.float32)
        # torch conv weight (out, in, 1, 1) -> (in, out) matmul form, wrapper-side
        w1 = jax.random.normal(kw1, (C, Cs), dtype=jnp.float32) * 0.1
        b1 = jax.random.normal(kb1, (1, Cs), dtype=jnp.float32) * 0.1
        w2 = jax.random.normal(kw2, (Cs, C), dtype=jnp.float32) * 0.1
        b2 = jax.random.normal(kb2, (1, C), dtype=jnp.float32) * 0.1
        ref = _reference(x, w1, b1, w2, b2)   # computed BEFORE the aliased kernel call
        out = jax.block_until_ready(
            squeeze_excitation_pallas(x, w1, b1, w2, b2, block_bytes=block_bytes))
        assert out.shape == (N, C, H, W)
        assert jnp.allclose(out, ref, atol=1e-4, rtol=1e-4), "mismatch vs reference"

    run_case(k1, N=2, C=32, H=16, W=16)                          # fused path, HW=256 (lane-dense)
    run_case(k2, N=2, C=32, H=7, W=7)                            # fused path, HW=49 -> padded to 128
    run_case(k3, N=2, C=16, H=16, W=16, block_bytes=8 * 1024)    # forces the HW-split fallback
    print("KERNEL_OK")
</pallas_src>

<mosaic_0001>
module attributes {stable_mosaic.version = 11 : i64} {
  func.func @_se_fused_kernel(%arg0: i32, %arg1: memref<2x32x256xf32, #tpu.memory_space<vmem>>, %arg2: memref<32x8xf32, #tpu.memory_space<vmem>>, %arg3: memref<1x8xf32, #tpu.memory_space<vmem>>, %arg4: memref<8x32xf32, #tpu.memory_space<vmem>>, %arg5: memref<1x32xf32, #tpu.memory_space<vmem>>, %arg6: memref<2x32x256xf32, #tpu.memory_space<vmem>>) attributes {dimension_semantics = [#tpu.dimension_semantics<parallel>], iteration_bounds = array<i64: 1>, scalar_prefetch = 0 : i64, scratch_operands = 0 : i64, tpu.core_type = #tpu.core_type<tc>, window_params = [{transform_indices = @transform_0, window_bounds = array<i64: 2, 32, 256>}, {pipeline_mode = #tpu.pipeline_mode<synchronous>, transform_indices = @transform_1, window_bounds = array<i64: 32, 8>}, {pipeline_mode = #tpu.pipeline_mode<synchronous>, transform_indices = @transform_2, window_bounds = array<i64: 1, 8>}, {pipeline_mode = #tpu.pipeline_mode<synchronous>, transform_indices = @transform_3, window_bounds = array<i64: 8, 32>}, {pipeline_mode = #tpu.pipeline_mode<synchronous>, transform_indices = @transform_4, window_bounds = array<i64: 1, 32>}, {transform_indices = @transform_5, window_bounds = array<i64: 2, 32, 256>}]} {
    %c0 = arith.constant 0 : index
    %c0_0 = arith.constant 0 : index
    %c0_1 = arith.constant 0 : index
    %0 = vector.load %arg1[%c0, %c0_0, %c0_1] : memref<2x32x256xf32, #tpu.memory_space<vmem>>, vector<2x32x256xf32>
    %cst = arith.constant dense<0.000000e+00> : vector<2x32xf32>
    %1 = vector.multi_reduction <add>, %0, %cst [2] : vector<2x32x256xf32> to vector<2x32xf32>
    %cst_2 = arith.constant 3.906250e-03 : f32
    %2 = vector.broadcast %cst_2 : f32 to vector<2x32xf32>
    %3 = arith.mulf %1, %2 : vector<2x32xf32>
    %c0_3 = arith.constant 0 : index
    %c0_4 = arith.constant 0 : index
    %4 = vector.load %arg2[%c0_3, %c0_4] : memref<32x8xf32, #tpu.memory_space<vmem>>, vector<32x8xf32>
    %cst_5 = arith.constant dense<0.000000e+00> : vector<2x8xf32>
    %5 = tpu.matmul %3, %4, %cst_5 {dimension_numbers = #tpu.dot_dimension_numbers<[1], [0], [0], [1], [0, 0, 1, 1], [], []>} : vector<2x32xf32>, vector<32x8xf32>, vector<2x8xf32> -> vector<2x8xf32>
    %c0_6 = arith.constant 0 : index
    %c0_7 = arith.constant 0 : index
    %6 = vector.load %arg3[%c0_6, %c0_7] : memref<1x8xf32, #tpu.memory_space<vmem>>, vector<1x8xf32>
    %7 = vector.broadcast %6 : vector<1x8xf32> to vector<2x8xf32>
    %8 = arith.addf %5, %7 : vector<2x8xf32>
    %cst_8 = arith.constant 0.000000e+00 : f32
    %9 = vector.broadcast %cst_8 : f32 to vector<2x8xf32>
    %10 = arith.maximumf %8, %9 : vector<2x8xf32>
    %c0_9 = arith.constant 0 : index
    %c0_10 = arith.constant 0 : index
    %11 = vector.load %arg4[%c0_9, %c0_10] : memref<8x32xf32, #tpu.memory_space<vmem>>, vector<8x32xf32>
    %cst_11 = arith.constant dense<0.000000e+00> : vector<2x32xf32>
    %12 = tpu.matmul %10, %11, %cst_11 {dimension_numbers = #tpu.dot_dimension_numbers<[1], [0], [0], [1], [0, 0, 1, 1], [], []>} : vector<2x8xf32>, vector<8x32xf32>, vector<2x32xf32> -> vector<2x32xf32>
    %c0_12 = arith.constant 0 : index
    %c0_13 = arith.constant 0 : index
    %13 = vector.load %arg5[%c0_12, %c0_13] : memref<1x32xf32, #tpu.memory_space<vmem>>, vector<1x32xf32>
    %14 = vector.broadcast %13 : vector<1x32xf32> to vector<2x32xf32>
    %15 = arith.addf %12, %14 : vector<2x32xf32>
    %cst_14 = arith.constant 3.000000e+00 : f32
    %16 = vector.broadcast %cst_14 : f32 to vector<2x32xf32>
    %17 = arith.addf %15, %16 : vector<2x32xf32>
    %cst_15 = arith.constant 0.000000e+00 : f32
    %cst_16 = arith.constant 6.000000e+00 : f32
    %18 = vector.broadcast %cst_15 : f32 to vector<2x32xf32>
    %19 = arith.maximumf %18, %17 : vector<2x32xf32>
    %20 = vector.broadcast %cst_16 : f32 to vector<2x32xf32>
    %21 = arith.minimumf %20, %19 : vector<2x32xf32>
    %cst_17 = arith.constant 0.166666672 : f32
    %22 = vector.broadcast %cst_17 : f32 to vector<2x32xf32>
    %23 = arith.mulf %21, %22 : vector<2x32xf32>
    %c0_18 = arith.constant 0 : index
    %c0_19 = arith.constant 0 : index
    %c0_20 = arith.constant 0 : index
    %24 = vector.load %arg1[%c0_18, %c0_19, %c0_20] : memref<2x32x256xf32, #tpu.memory_space<vmem>>, vector<2x32x256xf32>
    %25 = vector.shape_cast %23 : vector<2x32xf32> to vector<2x32x1xf32>
    %26 = vector.broadcast %25 : vector<2x32x1xf32> to vector<2x32x256xf32>
    %27 = arith.mulf %24, %26 : vector<2x32x256xf32>
    %c0_21 = arith.constant 0 : index
    %c0_22 = arith.constant 0 : index
    %c0_23 = arith.constant 0 : index
    %28 = vector.load %arg6[%c0_21, %c0_22, %c0_23] : memref<2x32x256xf32, #tpu.memory_space<vmem>>, vector<2x32x256xf32>
    tpu.vector_store %arg6[%c0_21, %c0_22, %c0_23], %27 {strides = array<i32>} : memref<2x32x256xf32, #tpu.memory_space<vmem>>, vector<2x32x256xf32>,
    return
  }
  func.func @transform_0(%arg0: i32) -> (i32, i32, i32) {
    %c0_i32 = arith.constant 0 : i32
    %c0_i32_0 = arith.constant 0 : i32
    %c0_i32_1 = arith.constant 0 : i32
    return %arg0, %c0_i32, %c0_i32_0 : i32, i32, i32
  }
  func.func @transform_1(%arg0: i32) -> (i32, i32) {
    %c0_i32 = arith.constant 0 : i32
    %c0_i32_0 = arith.constant 0 : i32
    %c0_i32_1 = arith.constant 0 : i32
    return %c0_i32, %c0_i32_0 : i32, i32
  }
  func.func @transform_2(%arg0: i32) -> (i32, i32) {
    %c0_i32 = arith.constant 0 : i32
    %c0_i32_0 = arith.constant 0 : i32
    %c0_i32_1 = arith.constant 0 : i32
    return %c0_i32, %c0_i32_0 : i32, i32
  }
  func.func @transform_3(%arg0: i32) -> (i32, i32) {
    %c0_i32 = arith.constant 0 : i32
    %c0_i32_0 = arith.constant 0 : i32
    %c0_i32_1 = arith.constant 0 : i32
    return %c0_i32, %c0_i32_0 : i32, i32
  }
  func.func @transform_4(%arg0: i32) -> (i32, i32) {
    %c0_i32 = arith.constant 0 : i32
    %c0_i32_0 = arith.constant 0 : i32
    %c0_i32_1 = arith.constant 0 : i32
    return %c0_i32, %c0_i32_0 : i32, i32
  }
  func.func @transform_5(%arg0: i32) -> (i32, i32, i32) {
    %c0_i32 = arith.constant 0 : i32
    %c0_i32_0 = arith.constant 0 : i32
    %c0_i32_1 = arith.constant 0 : i32
    return %arg0, %c0_i32, %c0_i32_0 : i32, i32, i32
  }
}

</mosaic_0001>

<bundles_post_ra>
// kernel: tpu_custom_call.1
= control target key start
LH: loop header
LB: loop body
LE: loop exit
PB: predicated region body
PF: predicated region fallthrough
CT: control target
= control target key end

     0   :  { %10 = vsyncpa [#allocation3], 0  ;;  %s483_s0 = inlined_call_operand.hbm [shape: f32[2,32,256], index: 0, kind: input, shape index: {}, may-alias: {0,5}]   ;;  %s484_s1 = inlined_call_operand.vmem [shape: f32[32,8], index: 1, kind: input, shape index: {}]   ;;  %s485_s2 = inlined_call_operand.vmem [shape: f32[1,8], index: 2, kind: input, shape index: {}]   ;;  %s486_s3 = inlined_call_operand.vmem [shape: f32[8,32], index: 3, kind: input, shape index: {}]   ;;  %s487_s4 = inlined_call_operand.vmem [shape: f32[1,32], index: 4, kind: input, shape index: {}]   ;;  %s488_s5 = inlined_call_operand.hbm [shape: f32[2,32,256], index: 5, kind: output, shape index: {}, may-alias: {0,5}]  }
   0x1   :  { %11 = vsyncpa [#allocation4], 0  ;;  %s16_s20 = sshll.u32 %s483_s0, 4  ;;  %s352_s21 = smov [#allocation2]   ;;  %s17_s20 = int_to_ptr.hbm [resolvable:$true] %s16_s20 }
   0x2   :  { %s18_s22 = sshll.u32 %s352_s21, 4  ;;  %s353_s23 = smov 256   ;;  %s19_s22 = int_to_ptr.vmem [resolvable:$true] %s18_s22 }
   0x3   :  { %s354_s24 = smov 16  }
   0x4   :  { %24 = dma.hbm_to_vmem [thread:$0]  %s17_s20, 2048, %s19_s22, [#allocation3], %s353_s23, %s353_s23, %s354_s24  }
   0x5   :  { %348 = dma.done.wait [#allocation3], 2048  }
   0x6   :  { %349 = vsyncadd [#allocation3], 4294965248  ;;  %v392_v0 = vld [vmem:[#allocation2 + $0x40] sm:$0xff]  ;;  %v394_v1 = vld [vmem:[#allocation2 + $0x48] sm:$0xff]  ;;  %v101_v31 = vlaneseq  ;;  %vm106_vm0 = vcmask 130112   ;;  %vm110_vm1 = vcmask 195712  }
   0x7   :  { %v396_v2 = vld [vmem:[#allocation2] sm:$0xff]  ;;  %v65_v3 = vadd.f32 %v394_v1, %v392_v0  ;;  %v400_v4 = vld [vmem:[#allocation2 + $0x8] sm:$0xff]  ;;  %v410_v9 = vld [vmem:[#allocation2 + $0x50] sm:$0xff]  ;;  %vm114_vm2 = vcmask 261312   ;;  %vm123_vm3 = vcmask 1041409   ;;  %vm125_vm4 = vcmask 261120  }
   0x8   :  { %v402_v5 = vld [vmem:[#allocation2 + $0x20] sm:$0xff]  ;;  %v404_v6 = vld [vmem:[#allocation2 + $0x28] sm:$0xff]  ;;  %v53_v7 = vadd.f32 %v400_v4, %v396_v2  ;;  %v412_v10 = vld [vmem:[#allocation2 + $0x58] sm:$0xff]  ;;  %v102_v32 = vand.u32 127, %v101_v31  ;;  %vm154_vm5 = vcmask 64512   ;;  %s270_s13 = sshll.u32 %s488_s5, 4  ;;  %s271_s13 = int_to_ptr.hbm [resolvable:$true] %s270_s13 }
   0x9   :  { %v59_v8 = vadd.f32 %v404_v6, %v402_v5  ;;  %66 = vadd.xlane.f32.xlu1 %v65_v3  ;;  %v414_v11 = vld [vmem:[#allocation2 + $0x10] sm:$0xff]  ;;  %v416_v12 = vld [vmem:[#allocation2 + $0x18] sm:$0xff]  ;;  %v418_v13 = vld [vmem:[#allocation2 + $0x60] sm:$0xff]  ;;  %v68_v15 = vadd.f32 %v412_v10, %v410_v9 }
   0xa   :  { %54 = vadd.xlane.f32.xlu0 %v53_v7  ;;  %v420_v14 = vld [vmem:[#allocation2 + $0x68] sm:$0xff]  ;;  %v56_v16 = vadd.f32 %v416_v12, %v414_v11  ;;  %v428_v18 = vld [vmem:[#allocation2 + $0x70] sm:$0xff]  ;;  %v430_v19 = vld [vmem:[#allocation2 + $0x78] sm:$0xff]  ;;  %v104_v34 = vadd.s32 4294967288, %v102_v32  ;;  %v108_v43 = vadd.s32 4294967280, %v102_v32  ;;  %v112_v47 = vadd.s32 4294967272, %v102_v32 }
   0xb   :  { %60 = vadd.xlane.f32.xlu2 %v59_v8  ;;  %v71_v17 = vadd.f32 %v420_v14, %v418_v13  ;;  %v432_v20 = vld [vmem:[#allocation2 + $0x30] sm:$0xff]  ;;  %v434_v21 = vld [vmem:[#allocation2 + $0x38] sm:$0xff]  ;;  %v74_v22 = vadd.f32 %v430_v19, %v428_v18  ;;  %v86_v26 = vld [vmem:[%s484_s1 + $0x8] sm:$0xff] }
   0xc   :  { %v62_v23 = vadd.f32 %v434_v21, %v432_v20  ;;  %v88_v24 = vld [vmem:[%s484_s1 + $0x18] sm:$0xff]  ;;  %v87_v25 = vld [vmem:[%s484_s1 + $0x10] sm:$0xff]  ;;  %v85_v27 = vld [vmem:[%s484_s1] sm:$0xff] }
   0xd   :  { %140 = vmatpush.msra.mxu0 %v88_v24  ;;  %v149_v3 = vld [vmem:[%s486_s3] sm:$0xff] }
   0xe   :  { %173 = vmatpush.msra.mxu1 %v149_v3  ;;  %v298_v7 = vld [vmem:[%s485_s2] ss:$0 sm:$0xff]  ;;  %s355_s2 = smov [#allocation5]  }
   0xf   :  { %141 = vmatpush.msra.mxu0 %v87_v25  ;;  %v299_v24 = vld [vmem:[%s487_s4] ss:$0 sm:$0xff]  ;;  %s268_s3 = sshll.u32 %s355_s2, 4  ;;  %s269_s3 = int_to_ptr.vmem [resolvable:$true] %s268_s3 }
  0x11   :  { %69 = vadd.xlane.f32.xlu1 %v68_v15  ;;  %142 = vmatpush.msra.mxu0 %v86_v26 }
  0x12   :  { %57 = vadd.xlane.f32.xlu0 %v56_v16 }
  0x13   :  { %72 = vadd.xlane.f32.xlu2 %v71_v17  ;;  %143 = vmatpush.msra.mxu0 %v85_v27  ;;  %v184_v17 = vshrl.u32 %v101_v31, 7 }
  0x15   :  { %289 = vset.pattern.permute.xlu2 %v184_v17  ;;  %v203_v31 = vadd.s32 24, %v184_v17 }
  0x19   :  { %75 = vadd.xlane.f32.xlu1 %v74_v22  ;;  %v197_v22 = vadd.s32 16, %v184_v17 }
  0x1a   :  { %63 = vadd.xlane.f32.xlu0 %v62_v23  ;;  %v191_v23 = vadd.s32 8, %v184_v17 }
  0x1b   :  { %291 = vset.pattern.permute.xlu1 %v197_v22 }
  0x1c   :  { %290 = vset.pattern.permute.xlu0 %v191_v23 }
  0x7c   :  { %v67_v28 = vpop.xlane.xlu1 %66 }
  0x7d   :  { %v55_v29 = vpop.xlane.xlu0 %54  ;;  %v81_v39 = vmul.f32 0.00390625, %v67_v28 }
  0x7e   :  { %v61_v30 = vpop.xlane.xlu2 %60  ;;  %v77_v40 = vmul.f32 0.00390625, %v55_v29 }
  0x7f   :  { %v116_v45 = vperm.slane %v81_v39, %v102_v32  ;;  %v79_v46 = vmul.f32 0.00390625, %v61_v30 }
  0x80   :  { %v103_v48 = vperm.slane %v77_v40, %v102_v32 }
  0x81   :  { %v109_v56 = vperm.slane %v79_v46, %v108_v43 }
  0x84   :  { %v70_v33 = vpop.xlane.xlu1 %69 }
  0x85   :  { %v82_v35 = vmul.f32 0.00390625, %v70_v33  ;;  %v58_v36 = vpop.xlane.xlu0 %57 }
  0x86   :  { %v73_v37 = vpop.xlane.xlu2 %72  ;;  %v78_v38 = vmul.f32 0.00390625, %v58_v36 }
  0x87   :  { %v83_v41 = vmul.f32 0.00390625, %v73_v37  ;;  %v117_v42 = vperm.slane %v82_v35, %v104_v34 }
  0x88   :  { %v105_v44 = vperm.slane %v78_v38, %v104_v34 }
  0x89   :  { %v119_v49 = vperm.slane %v83_v41, %v108_v43  ;;  %v118_v51 = vsel %vm106_vm0, %v117_v42, %v116_v45 }
  0x8a   :  { %v107_v54 = vsel %vm106_vm0, %v105_v44, %v103_v48 }
  0x8b   :  { %v120_v59 = vsel %vm110_vm1, %v119_v49, %v118_v51  ;;  %v111_v60 = vsel %vm110_vm1, %v109_v56, %v107_v54 }
  0x8c   :  { %v76_v50 = vpop.xlane.xlu1 %75 }
  0x8d   :  { %v84_v52 = vmul.f32 0.00390625, %v76_v50  ;;  %v64_v53 = vpop.xlane.xlu0 %63 }
  0x8e   :  { %v80_v55 = vmul.f32 0.00390625, %v64_v53 }
  0x8f   :  { %v121_v57 = vperm.slane %v84_v52, %v112_v47 }
  0x90   :  { %v113_v58 = vperm.slane %v80_v55, %v112_v47 }
  0x91   :  { %v122_v61 = vsel %vm114_vm2, %v121_v57, %v120_v59 }
  0x92   :  { %v115_v62 = vsel %vm114_vm2, %v113_v58, %v111_v60 }
  0x93   :  { %v124_v63 = vsel %vm123_vm3, %v122_v61, %v115_v62 }
  0x94   :  { %283 = vmatmul.msk.f32.vlgmr.msra.gmra.mxu0 %vm125_vm4, %v124_v63 }
 0x111   :  { %v145_v8 = vpop.f32.mrf.mxu0 }
 0x112   :  { %v146_v15 = vadd.f32 %v298_v7, %v145_v8 }
 0x114   :  { %v148_v16 = vmax.f32 %v146_v15, 0.0 }
 0x116   :  { %284 = vmatmul.msk.f32.vlgmr.msra.gmra.mxu1 %vm154_vm5, %v148_v16 }
 0x193   :  { %v175_v25 = vpop.f32.mrf.mxu1 }
 0x194   :  { %v176_v26 = vadd.f32 %v299_v24, %v175_v25 }
 0x196   :  { %v178_v27 = vadd.f32 3.0, %v176_v26 }
 0x198   :  { %v179_v28 = vmax.f32 %v178_v27, 0.0 }
 0x19a   :  { %v180_v29 = vmin.f32 %v179_v28, 6.0 }
 0x19c   :  { %v181_v30 = vmul.f32 0.16666667, %v180_v29 }
 0x19e   :  { %v182_v32 = vperm.slane %v181_v30, 0  ;;  %v207_v33 = vperm.slane %v181_v30, 1 }
 0x1a0   :  { %199 = vperm.xlu1 %291, %v182_v32   ;;  %193 = vperm.xlu0 %290, %v182_v32  }
 0x1a1   :  { %187 = vperm.xlu2 %289, %v182_v32  }
 0x1a8   :  { %294 = vset.pattern.permute.xlu1 %v191_v23  ;;  %297 = vset.pattern.permute.xlu0 %v203_v31 }
 0x1a9   :  { %292 = vset.pattern.permute.xlu2 %v203_v31 }
 0x1b0   :  { %218 = vperm.xlu1 %294, %v207_v33  }
 0x1b1   :  { %205 = vperm.xlu2 %292, %v182_v32  }
 0x1b8   :  { %296 = vset.pattern.permute.xlu1 %v203_v31 }
 0x1b9   :  { %293 = vset.pattern.permute.xlu2 %v184_v17 }
 0x1c0   :  { %230 = vperm.xlu1 %296, %v207_v33  }
 0x1c1   :  { %212 = vperm.xlu2 %293, %v207_v33  }
 0x1c9   :  { %295 = vset.pattern.permute.xlu2 %v197_v22 }
 0x1d1   :  { %224 = vperm.xlu2 %295, %v207_v33  }
 0x1fb   :  { %v188_v34 = vpop.permute.xlu2 %187 }
 0x1fc   :  { %v232_v35 = vmul.f32 %v188_v34, %v396_v2  ;;  %v233_v36 = vmul.f32 %v188_v34, %v400_v4 }
 0x1fe   :  { %248 = vst [vmem:[#allocation5] sm:$0xff] %v232_v35 }
 0x1ff   :  { %249 = vst [vmem:[#allocation5 + $0x8] sm:$0xff] %v233_v36 }
 0x20b   :  { %v206_v37 = vpop.permute.xlu2 %205 }
 0x20c   :  { %v238_v38 = vmul.f32 %v206_v37, %v432_v20  ;;  %v239_v39 = vmul.f32 %v206_v37, %v434_v21 }
 0x20e   :  { %254 = vst [vmem:[#allocation5 + $0x30] sm:$0xff] %v238_v38 }
 0x20f   :  { %255 = vst [vmem:[#allocation5 + $0x38] sm:$0xff] %v239_v39 }
 0x212   :  { %v200_v40 = vpop.permute.xlu1 %199  ;;  %v194_v41 = vpop.permute.xlu0 %193 }
 0x213   :  { %v236_v42 = vmul.f32 %v200_v40, %v402_v5  ;;  %v237_v43 = vmul.f32 %v200_v40, %v404_v6  ;;  %v234_v44 = vmul.f32 %v194_v41, %v414_v11  ;;  %v235_v2 = vmul.f32 %v194_v41, %v416_v12 }
 0x215   :  { %252 = vst [vmem:[#allocation5 + $0x20] sm:$0xff] %v236_v42 }
 0x216   :  { %253 = vst [vmem:[#allocation5 + $0x28] sm:$0xff] %v237_v43 }
 0x217   :  { %250 = vst [vmem:[#allocation5 + $0x10] sm:$0xff] %v234_v44 }
 0x218   :  { %251 = vst [vmem:[#allocation5 + $0x18] sm:$0xff] %v235_v2 }
 0x21b   :  { %v213_v4 = vpop.permute.xlu2 %212 }
 0x21c   :  { %v240_v20 = vmul.f32 %v213_v4, %v392_v0  ;;  %v241_v21 = vmul.f32 %v213_v4, %v394_v1 }
 0x21e   :  { %256 = vst [vmem:[#allocation5 + $0x40] sm:$0xff] %v240_v20 }
 0x21f   :  { %257 = vst [vmem:[#allocation5 + $0x48] sm:$0xff] %v241_v21 }
 0x222   :  { %v219_v45 = vpop.permute.xlu1 %218 }
 0x223   :  { %v242_v5 = vmul.f32 %v219_v45, %v410_v9  ;;  %v243_v6 = vmul.f32 %v219_v45, %v412_v10 }
 0x225   :  { %258 = vst [vmem:[#allocation5 + $0x50] sm:$0xff] %v242_v5 }
 0x226   :  { %259 = vst [vmem:[#allocation5 + $0x58] sm:$0xff] %v243_v6 }
 0x22b   :  { %v225_v11 = vpop.permute.xlu2 %224 }
 0x22c   :  { %v244_v12 = vmul.f32 %v225_v11, %v418_v13  ;;  %v245_v46 = vmul.f32 %v225_v11, %v420_v14 }
 0x22e   :  { %260 = vst [vmem:[#allocation5 + $0x60] sm:$0xff] %v244_v12 }
 0x22f   :  { %261 = vst [vmem:[#allocation5 + $0x68] sm:$0xff] %v245_v46 }
 0x232   :  { %v231_v0 = vpop.permute.xlu1 %230 }
 0x233   :  { %v246_v1 = vmul.f32 %v231_v0, %v428_v18  ;;  %v247_v9 = vmul.f32 %v231_v0, %v430_v19 }
 0x235   :  { %262 = vst [vmem:[#allocation5 + $0x70] sm:$0xff] %v246_v1 }
 0x236   :  { %263 = vst [vmem:[#allocation5 + $0x78] sm:$0xff] %v247_v9 }
 0x237   :  { %276 = dma.vmem_to_hbm [thread:$0]  %s269_s3, 2048, %s271_s13, [#allocation4], %s353_s23, %s353_s23, %s354_s24  }
 0x238   :  { %350 = dma.done.wait [#allocation4], 2048  }
 0x239   :  { %351 = vsyncadd [#allocation4], 4294965248 }
 0x23a   :  { %281 = vsyncpa [#allocation3], 1 }
 0x23b   :  { %282 = vsyncpa [#allocation4], 1 }

</bundles_post_ra>
